<compile_context>
chip_gen: v7x
topology: tpu7x:2x2x1
jax: 0.10.0
libtpu: 0.0.40
codegen_flags: <defaults>
</compile_context>

<pallas_src>
import jax
import jax.numpy as jnp
from jax import lax
from jax.experimental import pallas as pl
from jax.experimental.pallas import tpu as pltpu


def ddpg_critic_kernel(obs_ref, act_ref,
                       w1_ref, b1_ref,
                       w2o_ref, w2a_ref, b2_ref,
                       w3_ref, b3_ref,
                       q_ref):
    """One batch tile.  Activations live as [features, batch_tile] (batch on lanes)."""
    cdt = w1_ref.dtype                       # matmul compute dtype (f32 or bf16)
    obs = obs_ref[...].astype(cdt)           # (TB, OBS)  natural-layout tile
    act = act_ref[...].astype(cdt)           # (TB, ACT)

    # Layer 1: h1ᵀ = ReLU(W1ᵀ · obsᵀ + b1)  -> (H1, TB).
    # The input transpose is folded into the MXU contraction (q·kᵀ pattern),
    # so no wrapper-side or in-kernel transpose pass is needed.
    h1 = lax.dot_general(w1_ref[...], obs,
                         dimension_numbers=(((1,), (1,)), ((), ())),
                         preferred_element_type=jnp.float32)
    h1 = jnp.maximum(h1 + b1_ref[...], 0.0)

    # Layer 2: two accumulated dots (K=H1 and K=ACT) — equivalent to the
    # concat([h1, act]) @ W2 formulation, but with no concat copy and no
    # zero-padded act rows streamed from HBM.
    h2 = jnp.dot(w2o_ref[...], h1.astype(cdt),
                 preferred_element_type=jnp.float32)
    h2 = h2 + lax.dot_general(w2a_ref[...], act,
                              dimension_numbers=(((1,), (1,)), ((), ())),
                              preferred_element_type=jnp.float32)
    h2 = jnp.maximum(h2 + b2_ref[...], 0.0)                       # (H2, TB)

    # Output layer (N=1): keep it off the MXU — VPU multiply + sublane reduce.
    # Lands directly in the lane-dense (1, TB) output row.
    q = jnp.sum(h2 * w3_ref[...], axis=0, keepdims=True) + b3_ref[...]
    q_ref[...] = q.astype(q_ref.dtype)


def _choose_block_b(B, max_block=512, min_grid_steps=2):
    """Batch tile: as large as possible (multiple of 128) while keeping
    >= min_grid_steps grid iterations so both v7x TensorCores get work."""
    if B <= 128:
        return B                              # single exact tile, no padding
    bb = (B // min_grid_steps) // 128 * 128
    return max(128, min(max_block, bb))


def ddpg_critic_forward(obs, act, packed, *, block_b=None):
    """obs: [B, obs_size], act: [B, act_size]  ->  q: [B, 1] float32."""
    w1, b1, w2o, w2a, b2, w3, b3 = packed
    B, obs_size = obs.shape
    act_size = act.shape[1]
    h1_dim, h2_dim = w1.shape[0], w2o.shape[0]
    assert w1.shape[1] == obs_size and w2a.shape[1] == act_size

    if block_b is None:
        block_b = _choose_block_b(B)

    # Pad the batch only when it is ragged w.r.t. the tile (never for tiny B
    # or multiples of the tile, so the common paths pay zero staging traffic).
    rem = B % block_b
    if rem:
        pad = block_b - rem
        obs = jnp.pad(obs, ((0, pad), (0, 0)))
        act = jnp.pad(act, ((0, pad), (0, 0)))
    Bp = obs.shape[0]
    n_blk = Bp // block_b

    tile_in = lambda i: (i, 0)        # stream batch tiles of obs / act
    tile_out = lambda i: (0, i)       # lane-dense output row tiles
    const = lambda i: (0, 0)          # weights stay VMEM-resident across grid

    flops = 2 * Bp * (obs_size * h1_dim + h1_dim * h2_dim
                      + act_size * h2_dim + h2_dim)
    bytes_accessed = (obs.dtype.itemsize * Bp * obs_size
                      + act.dtype.itemsize * Bp * act_size
                      + sum(x.size * x.dtype.itemsize for x in packed)
                      + 4 * Bp)

    q_row = pl.pallas_call(
        ddpg_critic_kernel,
        out_shape=jax.ShapeDtypeStruct((1, Bp), jnp.float32),
        grid=(n_blk,),
        in_specs=[
            pl.BlockSpec((block_b, obs_size), tile_in),
            pl.BlockSpec((block_b, act_size), tile_in),
            pl.BlockSpec(w1.shape, const),
            pl.BlockSpec(b1.shape, const),
            pl.BlockSpec(w2o.shape, const),
            pl.BlockSpec(w2a.shape, const),
            pl.BlockSpec(b2.shape, const),
            pl.BlockSpec(w3.shape, const),
            pl.BlockSpec(b3.shape, const),
        ],
        out_specs=pl.BlockSpec((1, block_b), tile_out),
        compiler_params=pltpu.CompilerParams(
            dimension_semantics=("parallel",)),
        cost_estimate=pl.CostEstimate(
            flops=flops, transcendentals=0, bytes_accessed=bytes_accessed),
    )(obs, act, w1, b1, w2o, w2a, b2, w3, b3)

    return q_row[0, :B].reshape(B, 1)


def init_params(key, obs_size, act_size, h1, h2):
    """Logical (PyTorch-equivalent) parameters, stored as [in, out]."""
    ks = jax.random.split(key, 7)

    def uniform(k, shape, fan_in):
        bound = 1.0 / jnp.sqrt(fan_in)
        return jax.random.uniform(k, shape, jnp.float32, -bound, bound)

    w1 = uniform(ks[0], (obs_size, h1), obs_size)
    b1 = uniform(ks[1], (h1,), obs_size)
    w2o = uniform(ks[2], (h1, h2), h1 + act_size)
    w2a = uniform(ks[3], (act_size, h2), h1 + act_size)
    b2 = uniform(ks[4], (h2,), h1 + act_size)
    w3 = uniform(ks[5], (h2, 1), h2)
    b3 = uniform(ks[6], (1,), h2)
    return (w1, b1, w2o, w2a, b2, w3, b3)


def pack_params(params, dtype=jnp.float32):
    """Pre-transpose weights once for the batch-on-lanes kernel.

    Matmul weights are stored in `dtype` (jnp.bfloat16 halves streamed weight
    bytes and runs the MXU at native rate); biases and the N=1 output weights
    stay f32 because they feed f32 VPU math in the kernel.
    """
    w1, b1, w2o, w2a, b2, w3, b3 = params
    h1 = w1.shape[1]
    h2 = w2o.shape[1]
    return (w1.T.astype(dtype),                  # (H1, OBS)
            b1.reshape(h1, 1),                   # (H1, 1)  f32
            w2o.T.astype(dtype),                 # (H2, H1)
            w2a.T.astype(dtype),                 # (H2, ACT)
            b2.reshape(h2, 1),                   # (H2, 1)  f32
            w3.reshape(h2, 1),                   # (H2, 1)  f32 (VPU output layer)
            b3.reshape(1, 1))                    # (1, 1)   f32


def reference_forward(obs, act, params):
    w1, b1, w2o, w2a, b2, w3, b3 = params
    h1 = jnp.maximum(obs @ w1 + b1, 0.0)
    h2 = jnp.maximum(h1 @ w2o + act @ w2a + b2, 0.0)
    return h2 @ w3 + b3


if __name__ == "__main__":
    OBS, ACT, H1, H2 = 32, 8, 64, 32

    key = jax.random.PRNGKey(0)
    k_data, k_par = jax.random.split(key)
    params = init_params(k_par, OBS, ACT, H1, H2)

    # f32 end-to-end path: tight numerical check.
    #   B=8   -> single exact-size tile (no 128-column padding waste)
    #   B=256 -> two 128-column tiles (exercises the parallel batch grid)
    packed_f32 = pack_params(params, dtype=jnp.float32)
    for B in (8, 256):
        ko, ka = jax.random.split(jax.random.fold_in(k_data, B))
        obs = jax.random.normal(ko, (B, OBS), jnp.float32)
        act = jax.random.normal(ka, (B, ACT), jnp.float32)

        q = jax.block_until_ready(ddpg_critic_forward(obs, act, packed_f32))
        q_ref = reference_forward(obs, act, params)

        assert q.shape == (B, 1)
        assert jnp.allclose(q, q_ref, atol=1e-5, rtol=1e-5), \
            f"f32 mismatch vs JAX reference at B={B}"

    # bf16 streamed-data path (halved HBM bytes, native MXU rate): two 512-wide
    # batch tiles (>= 2 grid steps keeps both v7x TensorCores busy).
    packed_bf16 = pack_params(params, dtype=jnp.bfloat16)
    B = 1024
    ko, ka = jax.random.split(jax.random.fold_in(k_data, B))
    obs = jax.random.normal(ko, (B, OBS), jnp.float32)
    act = jax.random.normal(ka, (B, ACT), jnp.float32)

    q = jax.block_until_ready(
        ddpg_critic_forward(obs.astype(jnp.bfloat16),
                            act.astype(jnp.bfloat16),
                            packed_bf16))
    q_ref = reference_forward(obs, act, params)

    assert q.shape == (B, 1)
    assert jnp.allclose(q, q_ref, atol=5e-2, rtol=5e-2), \
        "bf16 mismatch vs JAX reference"

    print("KERNEL_OK")
</pallas_src>

<mosaic_0001>
module attributes {stable_mosaic.version = 11 : i64} {
  func.func @ddpg_critic_kernel(%arg0: i32, %arg1: memref<8x32xf32, #tpu.memory_space<vmem>>, %arg2: memref<8x8xf32, #tpu.memory_space<vmem>>, %arg3: memref<64x32xf32, #tpu.memory_space<vmem>>, %arg4: memref<64x1xf32, #tpu.memory_space<vmem>>, %arg5: memref<32x64xf32, #tpu.memory_space<vmem>>, %arg6: memref<32x8xf32, #tpu.memory_space<vmem>>, %arg7: memref<32x1xf32, #tpu.memory_space<vmem>>, %arg8: memref<32x1xf32, #tpu.memory_space<vmem>>, %arg9: memref<1x1xf32, #tpu.memory_space<vmem>>, %arg10: memref<1x8xf32, #tpu.memory_space<vmem>>) attributes {dimension_semantics = [#tpu.dimension_semantics<parallel>], iteration_bounds = array<i64: 1>, scalar_prefetch = 0 : i64, scratch_operands = 0 : i64, tpu.core_type = #tpu.core_type<tc>, window_params = [{transform_indices = @transform_0, window_bounds = array<i64: 8, 32>}, {transform_indices = @transform_1, window_bounds = array<i64: 8, 8>}, {pipeline_mode = #tpu.pipeline_mode<synchronous>, transform_indices = @transform_2, window_bounds = array<i64: 64, 32>}, {pipeline_mode = #tpu.pipeline_mode<synchronous>, transform_indices = @transform_3, window_bounds = array<i64: 64, 1>}, {pipeline_mode = #tpu.pipeline_mode<synchronous>, transform_indices = @transform_4, window_bounds = array<i64: 32, 64>}, {pipeline_mode = #tpu.pipeline_mode<synchronous>, transform_indices = @transform_5, window_bounds = array<i64: 32, 8>}, {pipeline_mode = #tpu.pipeline_mode<synchronous>, transform_indices = @transform_6, window_bounds = array<i64: 32, 1>}, {pipeline_mode = #tpu.pipeline_mode<synchronous>, transform_indices = @transform_7, window_bounds = array<i64: 32, 1>}, {pipeline_mode = #tpu.pipeline_mode<synchronous>, transform_indices = @transform_8, window_bounds = array<i64: 1, 1>}, {transform_indices = @transform_9, window_bounds = array<i64: 1, 8>}]} {
    %c0 = arith.constant 0 : index
    %c0_0 = arith.constant 0 : index
    %0 = vector.load %arg1[%c0, %c0_0] : memref<8x32xf32, #tpu.memory_space<vmem>>, vector<8x32xf32>
    %c0_1 = arith.constant 0 : index
    %c0_2 = arith.constant 0 : index
    %1 = vector.load %arg2[%c0_1, %c0_2] : memref<8x8xf32, #tpu.memory_space<vmem>>, vector<8x8xf32>
    %c0_3 = arith.constant 0 : index
    %c0_4 = arith.constant 0 : index
    %2 = vector.load %arg3[%c0_3, %c0_4] : memref<64x32xf32, #tpu.memory_space<vmem>>, vector<64x32xf32>
    %cst = arith.constant dense<0.000000e+00> : vector<64x8xf32>
    %3 = tpu.matmul %2, %0, %cst {dimension_numbers = #tpu.dot_dimension_numbers<[1], [1], [0], [0], [0, 0, 1, 0], [], []>} : vector<64x32xf32>, vector<8x32xf32>, vector<64x8xf32> -> vector<64x8xf32>
    %c0_5 = arith.constant 0 : index
    %c0_6 = arith.constant 0 : index
    %4 = vector.load %arg4[%c0_5, %c0_6] : memref<64x1xf32, #tpu.memory_space<vmem>>, vector<64x1xf32>
    %5 = vector.broadcast %4 : vector<64x1xf32> to vector<64x8xf32>
    %6 = arith.addf %3, %5 : vector<64x8xf32>
    %cst_7 = arith.constant 0.000000e+00 : f32
    %7 = vector.broadcast %cst_7 : f32 to vector<64x8xf32>
    %8 = arith.maximumf %6, %7 : vector<64x8xf32>
    %c0_8 = arith.constant 0 : index
    %c0_9 = arith.constant 0 : index
    %9 = vector.load %arg5[%c0_8, %c0_9] : memref<32x64xf32, #tpu.memory_space<vmem>>, vector<32x64xf32>
    %cst_10 = arith.constant dense<0.000000e+00> : vector<32x8xf32>
    %10 = tpu.matmul %9, %8, %cst_10 {dimension_numbers = #tpu.dot_dimension_numbers<[1], [0], [0], [1], [0, 0, 1, 1], [], []>} : vector<32x64xf32>, vector<64x8xf32>, vector<32x8xf32> -> vector<32x8xf32>
    %c0_11 = arith.constant 0 : index
    %c0_12 = arith.constant 0 : index
    %11 = vector.load %arg6[%c0_11, %c0_12] : memref<32x8xf32, #tpu.memory_space<vmem>>, vector<32x8xf32>
    %cst_13 = arith.constant dense<0.000000e+00> : vector<32x8xf32>
    %12 = tpu.matmul %11, %1, %cst_13 {dimension_numbers = #tpu.dot_dimension_numbers<[1], [1], [0], [0], [0, 0, 1, 0], [], []>} : vector<32x8xf32>, vector<8x8xf32>, vector<32x8xf32> -> vector<32x8xf32>
    %13 = arith.addf %10, %12 : vector<32x8xf32>
    %c0_14 = arith.constant 0 : index
    %c0_15 = arith.constant 0 : index
    %14 = vector.load %arg7[%c0_14, %c0_15] : memref<32x1xf32, #tpu.memory_space<vmem>>, vector<32x1xf32>
    %15 = vector.broadcast %14 : vector<32x1xf32> to vector<32x8xf32>
    %16 = arith.addf %13, %15 : vector<32x8xf32>
    %cst_16 = arith.constant 0.000000e+00 : f32
    %17 = vector.broadcast %cst_16 : f32 to vector<32x8xf32>
    %18 = arith.maximumf %16, %17 : vector<32x8xf32>
    %c0_17 = arith.constant 0 : index
    %c0_18 = arith.constant 0 : index
    %19 = vector.load %arg8[%c0_17, %c0_18] : memref<32x1xf32, #tpu.memory_space<vmem>>, vector<32x1xf32>
    %20 = vector.broadcast %19 : vector<32x1xf32> to vector<32x8xf32>
    %21 = arith.mulf %18, %20 : vector<32x8xf32>
    %cst_19 = arith.constant dense<0.000000e+00> : vector<8xf32>
    %22 = vector.multi_reduction <add>, %21, %cst_19 [0] : vector<32x8xf32> to vector<8xf32>
    %23 = vector.shape_cast %22 : vector<8xf32> to vector<1x8xf32>
    %c0_20 = arith.constant 0 : index
    %c0_21 = arith.constant 0 : index
    %24 = vector.load %arg9[%c0_20, %c0_21] : memref<1x1xf32, #tpu.memory_space<vmem>>, vector<1x1xf32>
    %25 = vector.broadcast %24 : vector<1x1xf32> to vector<1x8xf32>
    %26 = arith.addf %23, %25 : vector<1x8xf32>
    %c0_22 = arith.constant 0 : index
    %c0_23 = arith.constant 0 : index
    %27 = vector.load %arg10[%c0_22, %c0_23] : memref<1x8xf32, #tpu.memory_space<vmem>>, vector<1x8xf32>
    tpu.vector_store %arg10[%c0_22, %c0_23], %26 {strides = array<i32>} : memref<1x8xf32, #tpu.memory_space<vmem>>, vector<1x8xf32>,
    return
  }
  func.func @transform_0(%arg0: i32) -> (i32, i32) {
    %c0_i32 = arith.constant 0 : i32
    %c0_i32_0 = arith.constant 0 : i32
    return %arg0, %c0_i32 : i32, i32
  }
  func.func @transform_1(%arg0: i32) -> (i32, i32) {
    %c0_i32 = arith.constant 0 : i32
    %c0_i32_0 = arith.constant 0 : i32
    return %arg0, %c0_i32 : i32, i32
  }
  func.func @transform_2(%arg0: i32) -> (i32, i32) {
    %c0_i32 = arith.constant 0 : i32
    %c0_i32_0 = arith.constant 0 : i32
    %c0_i32_1 = arith.constant 0 : i32
    return %c0_i32, %c0_i32_0 : i32, i32
  }
  func.func @transform_3(%arg0: i32) -> (i32, i32) {
    %c0_i32 = arith.constant 0 : i32
    %c0_i32_0 = arith.constant 0 : i32
    %c0_i32_1 = arith.constant 0 : i32
    return %c0_i32, %c0_i32_0 : i32, i32
  }
  func.func @transform_4(%arg0: i32) -> (i32, i32) {
    %c0_i32 = arith.constant 0 : i32
    %c0_i32_0 = arith.constant 0 : i32
    %c0_i32_1 = arith.constant 0 : i32
    return %c0_i32, %c0_i32_0 : i32, i32
  }
  func.func @transform_5(%arg0: i32) -> (i32, i32) {
    %c0_i32 = arith.constant 0 : i32
    %c0_i32_0 = arith.constant 0 : i32
    %c0_i32_1 = arith.constant 0 : i32
    return %c0_i32, %c0_i32_0 : i32, i32
  }
  func.func @transform_6(%arg0: i32) -> (i32, i32) {
    %c0_i32 = arith.constant 0 : i32
    %c0_i32_0 = arith.constant 0 : i32
    %c0_i32_1 = arith.constant 0 : i32
    return %c0_i32, %c0_i32_0 : i32, i32
  }
  func.func @transform_7(%arg0: i32) -> (i32, i32) {
    %c0_i32 = arith.constant 0 : i32
    %c0_i32_0 = arith.constant 0 : i32
    %c0_i32_1 = arith.constant 0 : i32
    return %c0_i32, %c0_i32_0 : i32, i32
  }
  func.func @transform_8(%arg0: i32) -> (i32, i32) {
    %c0_i32 = arith.constant 0 : i32
    %c0_i32_0 = arith.constant 0 : i32
    %c0_i32_1 = arith.constant 0 : i32
    return %c0_i32, %c0_i32_0 : i32, i32
  }
  func.func @transform_9(%arg0: i32) -> (i32, i32) {
    %c0_i32 = arith.constant 0 : i32
    %c0_i32_0 = arith.constant 0 : i32
    return %c0_i32, %arg0 : i32, i32
  }
}

</mosaic_0001>

<bundles_post_ra>
// kernel: tpu_custom_call.1
= control target key start
LH: loop header
LB: loop body
LE: loop exit
PB: predicated region body
PF: predicated region fallthrough
CT: control target
= control target key end

     0   :  { %s878_s0 = inlined_call_operand.vmem [shape: f32[8,32], index: 0, kind: input, shape index: {}]   ;;  %s879_s1 = inlined_call_operand.vmem [shape: f32[8,8], index: 1, kind: input, shape index: {}]   ;;  %s880_s2 = inlined_call_operand.vmem [shape: f32[64,32], index: 2, kind: input, shape index: {}]   ;;  %s881_s3 = inlined_call_operand.vmem [shape: f32[64,1], index: 3, kind: input, shape index: {}]   ;;  %s882_s4 = inlined_call_operand.vmem [shape: f32[32,64], index: 4, kind: input, shape index: {}]   ;;  %s883_s5 = inlined_call_operand.vmem [shape: f32[32,8], index: 5, kind: input, shape index: {}]   ;;  %s884_s6 = inlined_call_operand.vmem [shape: f32[32,1], index: 6, kind: input, shape index: {}]   ;;  %s885_s7 = inlined_call_operand.vmem [shape: f32[32,1], index: 7, kind: input, shape index: {}]   ;;  %s886_s8 = inlined_call_operand.<no memory space> [shape: f32[1,1], index: 8, kind: input, shape index: {}]   ;;  %s887_s9 = inlined_call_operand.hbm [shape: f32[1,8], index: 9, kind: output, shape index: {}]  }
   0x1   :  { %v14_v0 = vstv %s886_s8 }
   0x2   :  { %15 = vst [vmem:[#allocation2] sm:$0x1] %v14_v0 }
   0x3   :  { %v35_v1 = vld [vmem:[%s878_s0] sm:$0xff]  ;;  %vm93_vm0 = vcmask 261120   ;;  %v38_v3 = vld [vmem:[%s880_s2 + $0x8] sm:$0xff]  ;;  %v685_v4 = vmov 0   ;;  %v39_v5 = vld [vmem:[%s880_s2 + $0x10] sm:$0xff] }
   0x4   :  { %v37_v2 = vld [vmem:[%s880_s2] sm:$0xff]  ;;  %585 = vmatprep.subr.msk.mxu0 %vm93_vm0, %v35_v1  ;;  %659 = vset.pattern.permute.xlu0 %v685_v4  ;;  %v47_v7 = vld [vmem:[%s881_s3 + $0x10] sm:$0xff]  ;;  %v46_v8 = vld [vmem:[%s881_s3 + $0x8] sm:$0xff] }
   0x5   :  { %587 = vmatprep.mubr.msk.f32.mxu0 %vm93_vm0, %v37_v2  ;;  %586 = vmatpush3.xpose.msk.msra.mxu0 %vm93_vm0, %v35_v1  ;;  %v45_v6 = vld [vmem:[%s881_s3] sm:$0xff]  ;;  %v48_v9 = vld [vmem:[%s881_s3 + $0x18] sm:$0xff] }
   0x6   :  { %660 = vset.pattern.permute.xlu1 %v685_v4  ;;  %55 = vperm.xlu0 %659, %v45_v6   ;;  %v40_v10 = vld [vmem:[%s880_s2 + $0x18] sm:$0xff]  ;;  %v41_v11 = vld [vmem:[%s880_s2 + $0x20] sm:$0xff] }
   0x7   :  { %65 = vperm.xlu1 %660, %v47_v7  }
   0x8   :  { %588 = vmatmul.mubr.msk.f32.vlgmr.msra.gmra.mrb[0].mxu0 %vm93_vm0, %v38_v3 }
   0x9   :  { %590 = vmatprep.mubr.msk.f32.mxu0 %vm93_vm0, %v39_v5 }
   0xa   :  { %60 = vperm.xlu0 %659, %v46_v8  }
   0xb   :  { %70 = vperm.xlu1 %660, %v48_v9  }
   0xc   :  { %16 = vsyncpa [#allocation4], 0  ;;  %591 = vmatmul.mubr.msk.f32.gmra.mrb[2].mxu0 %vm93_vm0, %v40_v10  ;;  %v49_v12 = vld [vmem:[%s881_s3 + $0x20] sm:$0xff]  ;;  %v50_v13 = vld [vmem:[%s881_s3 + $0x28] sm:$0xff]  ;;  %vm242_vm1 = vcmask 64512   ;;  %vm343_vm2 = vcmask 523264  }
   0xd   :  { %593 = vmatprep.mubr.msk.f32.mxu0 %vm93_vm0, %v41_v11  ;;  %v42_v14 = vld [vmem:[%s880_s2 + $0x28] sm:$0xff]  ;;  %v43_v15 = vld [vmem:[%s880_s2 + $0x30] sm:$0xff]  ;;  %v52_v17 = vld [vmem:[%s881_s3 + $0x38] sm:$0xff]  ;;  %vm525_vm3 = vcmask 57344  }
   0xe   :  { %75 = vperm.xlu0 %659, %v49_v12   ;;  %v51_v16 = vld [vmem:[%s881_s3 + $0x30] sm:$0xff]  ;;  %v44_v18 = vld [vmem:[%s880_s2 + $0x38] sm:$0xff]  ;;  %v441_v19 = vld [vmem:[%s884_s6] sm:$0xff] }
   0xf   :  { %80 = vperm.xlu1 %660, %v50_v13   ;;  %v442_v20 = vld [vmem:[%s884_s6 + $0x8] sm:$0xff]  ;;  %v443_v21 = vld [vmem:[%s884_s6 + $0x10] sm:$0xff]  ;;  %v444_v22 = vld [vmem:[%s884_s6 + $0x18] sm:$0xff] }
  0x10   :  { %594 = vmatmul.mubr.msk.f32.gmra.mrb[4].mxu0 %vm93_vm0, %v42_v14  ;;  %v473_v23 = vld [vmem:[%s885_s7] sm:$0xff]  ;;  %v474_v24 = vld [vmem:[%s885_s7 + $0x8] sm:$0xff]  ;;  %v475_v25 = vld [vmem:[%s885_s7 + $0x10] sm:$0xff] }
  0x11   :  { %596 = vmatprep.mubr.msk.f32.mxu0 %vm93_vm0, %v43_v15  ;;  %v476_v26 = vld [vmem:[%s885_s7 + $0x18] sm:$0xff]  ;;  %v514_v27 = vld [vmem:[#allocation2] sm:$0x1]  ;;  %v239_v30 = vld [vmem:[%s883_s5 + $0x8] sm:$0xff] }
  0x12   :  { %85 = vperm.xlu0 %659, %v51_v16   ;;  %v36_v28 = vld [vmem:[%s879_s1] sm:$0xff]  ;;  %v240_v31 = vld [vmem:[%s883_s5 + $0x10] sm:$0xff]  ;;  %v241_v32 = vld [vmem:[%s883_s5 + $0x18] sm:$0xff] }
  0x13   :  { %90 = vperm.xlu1 %660, %v52_v17   ;;  %599 = vmatprep.subr.msk.mxu1 %vm242_vm1, %v36_v28  ;;  %v238_v29 = vld [vmem:[%s883_s5] sm:$0xff]  ;;  %v236_v34 = vld [vmem:[%s882_s4 + $0x10] sm:$0xff]  ;;  %v235_v7 = vld [vmem:[%s882_s4 + $0x8] sm:$0xff] }
  0x14   :  { %597 = vmatmul.mubr.msk.f32.gmra.mrb[6].mxu0 %vm93_vm0, %v44_v18  ;;  %600 = vmatpush3.xpose.msk.msra.mxu1 %vm242_vm1, %v36_v28  ;;  %v234_v33 = vld [vmem:[%s882_s4] sm:$0xff]  ;;  %v237_v8 = vld [vmem:[%s882_s4 + $0x18] sm:$0xff]  ;;  %s686_s4 = smov [#allocation3]  }
  0x15   :  { %601 = vmatprep.mubr.msk.f32.mxu1 %vm242_vm1, %v238_v29  ;;  %623 = vmatprep.mubr.msk.f32.mxu0 %vm343_vm2, %v234_v33  ;;  %s533_s24 = sshll.u32 %s686_s4, 4  ;;  %s534_s24 = int_to_ptr.vmem [resolvable:$true] %s533_s24 }
  0x16   :  { %447 = vperm.xlu0 %659, %v441_v19   ;;  %s661_s25 = scalar_lea.vmem %s534_s24, 16  ;;  %s665_s2 = scalar_lea.vmem %s534_s24, 32 }
  0x17   :  { %452 = vperm.xlu1 %660, %v442_v20   ;;  %602 = vmatmul.mubr.msk.f32.vlgmr.msra.gmra.mrb[0].mxu1 %vm242_vm1, %v239_v30  ;;  %p662_p0 = scmp.ne.s32.totalorder %s534_s24, %s661_s25  ;;  %p666_p1 = scmp.lt.s32.totalorder %s534_s24, %s534_s24 }
  0x18   :  { %604 = vmatprep.mubr.msk.f32.mxu1 %vm242_vm1, %v240_v31  ;;  %p667_p2 = scmp.lt.s32.totalorder %s665_s2, %s661_s25 }
  0x1a   :  { %457 = vperm.xlu0 %659, %v443_v21   ;;  %p668_p3 = por %p667_p2, %p666_p1 }
  0x1b   :  { %462 = vperm.xlu1 %660, %v444_v22   ;;  %605 = vmatmul.mubr.msk.f32.gmra.mrb[2].mxu1 %vm242_vm1, %v241_v32 }
  0x1c   :  { %626 = vmatprep.mubr.msk.f32.mxu1 %vm343_vm2, %v236_v34  ;;  %p669_p4 = pnand %p668_p3, %p662_p0 }
  0x1e   :  { %479 = vperm.xlu0 %659, %v473_v23  }
  0x1f   :  { %484 = vperm.xlu1 %660, %v474_v24  }
  0x22   :  { %489 = vperm.xlu0 %659, %v475_v25  }
  0x23   :  { %494 = vperm.xlu1 %660, %v476_v26  }
  0x26   :  { %517 = vperm.xlu0 %659, %v514_v27  }
  0x85   :  { %v56_v35 = vpop.permute.xlu0 %55 }
  0x86   :  { %v66_v36 = vpop.permute.xlu1 %65 }
  0x89   :  { %v61_v37 = vpop.permute.xlu0 %60 }
  0x8a   :  { %v71_v38 = vpop.permute.xlu1 %70 }
  0x8d   :  { %v76_v51 = vpop.permute.xlu0 %75 }
  0x8e   :  { %v81_v48 = vpop.permute.xlu1 %80 }
  0x91   :  { %v86_v63 = vpop.permute.xlu0 %85 }
  0x92   :  { %v91_v60 = vpop.permute.xlu1 %90 }
  0x95   :  { %v448_v11 = vpop.permute.xlu0 %447 }
  0x96   :  { %v453_v12 = vpop.permute.xlu1 %452 }
  0x99   :  { %v458_v13 = vpop.permute.xlu0 %457 }
  0x9a   :  { %v463_v14 = vpop.permute.xlu1 %462 }
  0x9d   :  { %v480_v15 = vpop.permute.xlu0 %479 }
  0x9e   :  { %v485_v24 = vpop.permute.xlu1 %484 }
  0xa1   :  { %v490_v31 = vpop.permute.xlu0 %489 }
  0xdb   :  { %v589_v39 = vpop.f32.mrb[0].mxu0 }
  0xdc   :  { %v193_v40 = vadd.f32 %v589_v39, %v61_v37  ;;  %v187_v41 = vpop.f32.mrb[1].mxu0 }
  0xdd   :  { %v188_v42 = vadd.f32 %v187_v41, %v56_v35  ;;  %v495_v35 = vpop.permute.xlu1 %494 }
  0xde   :  { %v227_v43 = vmax.f32 %v193_v40, 0.0 }
  0xdf   :  { %v226_v44 = vmax.f32 %v188_v42, 0.0  ;;  %v592_v45 = vpop.f32.mrb[2].mxu0 }
  0xe0   :  { %v203_v46 = vadd.f32 %v592_v45, %v71_v38  ;;  %v197_v47 = vpop.f32.mrb[3].mxu0 }
  0xe1   :  { %v629_v49 = vpack.c.bf16 %v227_v43, %v226_v44  ;;  %v198_v50 = vadd.f32 %v197_v47, %v66_v36  ;;  %v520_v43 = vlaneseq }
  0xe2   :  { %v229_v52 = vmax.f32 %v203_v46, 0.0 }
  0xe3   :  { %v228_v53 = vmax.f32 %v198_v50, 0.0  ;;  %v595_v54 = vpop.f32.mrb[4].mxu0  ;;  %630 = vmatprep.subr.bf16.mxu0 %v629_v49  ;;  %645 = vmatprep.subr.bf16.mxu1 %v629_v49  ;;  %v521_v46 = vshrl.u32 %v520_v43, 7 }
  0xe4   :  { %v213_v55 = vadd.f32 %v595_v54, %v81_v48  ;;  %v207_v56 = vpop.f32.mrb[5].mxu0  ;;  %632 = vmatpush3.bf16.msra.mxu0 %v629_v49  ;;  %649 = vmatpush3.bf16.msra.mxu1 %v629_v49 }
  0xe5   :  { %v633_v57 = vpack.c.bf16 %v229_v52, %v228_v53  ;;  %v208_v58 = vadd.f32 %v207_v56, %v76_v51  ;;  %v522_v49 = vsub.s32 0, %v521_v46  ;;  %v518_v51 = vpop.permute.xlu0 %517 }
  0xe6   :  { %v231_v59 = vmax.f32 %v213_v55, 0.0 }
  0xe7   :  { %v230_v61 = vmax.f32 %v208_v58, 0.0  ;;  %v598_v62 = vpop.f32.mrb[6].mxu0  ;;  %634 = vmatprep.subr.bf16.mxu0 %v633_v57  ;;  %646 = vmatprep.subr.bf16.mxu1 %v633_v57  ;;  %v523_v53 = vrot.slane %v518_v51, %v522_v49 }
  0xe8   :  { %v223_v0 = vadd.f32 %v598_v62, %v91_v60  ;;  %v217_v1 = vpop.f32.mrb[7].mxu0  ;;  %636 = vmatpush3.bf16.msra.mxu0 %v633_v57  ;;  %650 = vmatpush3.bf16.msra.mxu1 %v633_v57 }
  0xe9   :  { %v637_v2 = vpack.c.bf16 %v231_v59, %v230_v61  ;;  %v218_v3 = vadd.f32 %v217_v1, %v86_v63 }
  0xea   :  { %v233_v4 = vmax.f32 %v223_v0, 0.0  ;;  %v603_v9 = vpop.f32.mrb[0].mxu1 }
  0xeb   :  { %v232_v5 = vmax.f32 %v218_v3, 0.0  ;;  %638 = vmatprep.subr.bf16.mxu0 %v637_v2  ;;  %647 = vmatprep.subr.bf16.mxu1 %v637_v2  ;;  %v324_v10 = vpop.f32.mrb[1].mxu1 }
  0xec   :  { %640 = vmatpush3.bf16.msra.mxu0 %v637_v2  ;;  %651 = vmatpush3.bf16.msra.mxu1 %v637_v2 }
  0xed   :  { %v641_v6 = vpack.c.bf16 %v233_v4, %v232_v5 }
  0xef   :  { %642 = vmatprep.subr.bf16.mxu0 %v641_v6  ;;  %648 = vmatprep.subr.bf16.mxu1 %v641_v6 }
  0xf0   :  { %644 = vmatpush3.bf16.msra.mxu0 %v641_v6  ;;  %652 = vmatpush3.bf16.msra.mxu1 %v641_v6 }
  0xf3   :  { %624 = vmatmul.mubr.msk.f32.vlgmr.msra.gmra.mrb[8].mxu0 %vm343_vm2, %v235_v7  ;;  %627 = vmatmul.mubr.msk.f32.vlgmr.msra.gmra.mrb[2].mxu1 %vm343_vm2, %v237_v8 }
 0x1c6   :  { %v625_v16 = vpop.f32.mrb[8].mxu0  ;;  %v628_v17 = vpop.f32.mrb[2].mxu1 }
 0x1c7   :  { %v428_v18 = vadd.f32 %v625_v16, %v603_v9  ;;  %v422_v19 = vpop.f32.mrb[9].mxu0  ;;  %v432_v20 = vpop.f32.mrb[3].mxu1  ;;  %v468_v21 = vadd.f32 %v628_v17, %v463_v14 }
 0x1c8   :  { %v423_v22 = vadd.f32 %v422_v19, %v324_v10  ;;  %v467_v23 = vadd.f32 %v458_v13, %v432_v20 }
 0x1c9   :  { %v466_v25 = vadd.f32 %v453_v12, %v428_v18  ;;  %v472_v29 = vmax.f32 %v468_v21, 0.0 }
 0x1ca   :  { %v465_v26 = vadd.f32 %v448_v11, %v423_v22  ;;  %v471_v27 = vmax.f32 %v467_v23, 0.0 }
 0x1cb   :  { %v470_v28 = vmax.f32 %v466_v25, 0.0  ;;  %v500_v37 = vmul.f32 %v495_v35, %v472_v29 }
 0x1cc   :  { %v469_v30 = vmax.f32 %v465_v26, 0.0  ;;  %v499_v34 = vmul.f32 %v490_v31, %v471_v27 }
 0x1cd   :  { %v498_v32 = vmul.f32 %v485_v24, %v470_v28  ;;  %v506_v42 = vsel %vm242_vm1, %v500_v37, 0.0 }
 0x1ce   :  { %v497_v33 = vmul.f32 %v480_v15, %v469_v30  ;;  %v504_v40 = vsel %vm242_vm1, %v499_v34, 0.0 }
 0x1cf   :  { %v502_v36 = vsel %vm242_vm1, %v498_v32, 0.0 }
 0x1d0   :  { %v501_v38 = vsel %vm242_vm1, %v497_v33, 0.0 }
 0x1d1   :  { %v503_v39 = vadd.f32 %v502_v36, %v501_v38 }
 0x1d3   :  { %v505_v41 = vadd.f32 %v504_v40, %v503_v39 }
 0x1d5   :  { %v507_v44 = vadd.f32 %v506_v42, %v505_v41 }
 0x1d7   :  { %v508_v45 = vrot.slane %v507_v44, 4 }
 0x1d9   :  { %v509_v47 = vadd.f32 %v508_v45, %v507_v44 }
 0x1db   :  { %v510_v48 = vrot.slane %v509_v47, 2 }
 0x1dd   :  { %v511_v50 = vadd.f32 %v510_v48, %v509_v47 }
 0x1df   :  { %v512_v52 = vrot.slane %v511_v50, 1 }
 0x1e1   :  { %v513_v54 = vadd.f32 %v512_v52, %v511_v50 }
 0x1e3   :  { %v524_v55 = vadd.f32 %v523_v53, %v513_v54 }
 0x1e5   :  { %526 = vst.msk [vmem:[#allocation3] sm:$0x1] %vm525_vm3, %v524_v55 }
 0x1e6   :  { %672 = shalt.err (!%p669_p4)
}
 0x1e7   :  { %s673_s28 = scalar_lea.hbm %s887_s9, 16 }
 0x1e8   :  { %p674_p5 = scmp.ne.s32.totalorder %s887_s9, %s673_s28  ;;  %p677_p6 = scmp.lt.u32.totalorder %s673_s28, %s887_s9 }
 0x1ea   :  { %p679_p7 = pnand %p677_p6, %p674_p5 }
 0x1ec   :  { %682 = shalt.err (!%p679_p7)
}
 0x1ed   :  { %536 = dma.vmem_to_hbm [thread:$0]  %s534_s24, 16, %s887_s9, [#allocation4]  }
 0x1ee   :  { %683 = dma.done.wait [#allocation4], 16  }
 0x1ef   :  { %684 = vsyncadd [#allocation4], 4294967280 }
 0x1f0   :  { %540 = vsyncpa [#allocation4], 1 }

</bundles_post_ra>
